<compile_context>
chip_gen: v7x
topology: tpu7x:2x2x1
jax: 0.10.0
libtpu: 0.0.40
codegen_flags: <defaults>
</compile_context>

<pallas_src>
import functools
import math

import jax
import jax.numpy as jnp
from jax import lax
from jax.experimental import pallas as pl
from jax.experimental.pallas import tpu as pltpu

_OFF = 8  # sublane-aligned offset of the un-padded rows inside the halo scratch


# ----------------------------- kernel ------------------------------------- #

def _conv1d_block_kernel(x_ref, w_ref, p_ref, m_ref, mt_ref, o_ref, xpad_ref, *,
                         K, H, pad, eps, bt, inv_cnt, mish):
    # x_ref:    (bt, C_in, H)       NCW input block (original dtype)
    # w_ref:    (K*C_in, Tco)       conv weight, taps stacked on contraction axis
    # p_ref:    (8, Tco)            row0 bias, row1 gamma, row2 beta (f32)
    # m_ref:    (G_t, Tco)          one-hot group membership
    # mt_ref:   (Tco, G_t)          its transpose
    # o_ref:    (bt, Tco, H)        NCW output block
    # xpad_ref: (bt, 8+H+8, C_in)   NWC zero-haloed input scratch (compute dtype)
    c_in = x_ref.shape[1]
    tco = o_ref.shape[1]

    # ---- halo build: only when the batch block changes (j == 0) ----
    @pl.when(pl.program_id(1) == 0)
    def _():
        if pad > 0:
            xpad_ref[:, _OFF - pad:_OFF, :] = jnp.zeros(
                (bt, pad, c_in), xpad_ref.dtype)
            xpad_ref[:, _OFF + H:_OFF + H + pad, :] = jnp.zeros(
                (bt, pad, c_in), xpad_ref.dtype)
        # NCW -> NWC transpose in-kernel (XLU has slack), then cast to MXU dtype.
        xpad_ref[:, _OFF:_OFF + H, :] = jnp.transpose(
            x_ref[...].astype(jnp.float32), (0, 2, 1)).astype(xpad_ref.dtype)

    # Lane-dense per-channel parameters.
    b_row = p_ref[0:1, :]        # (1, Tco) bias
    g_row = p_ref[1:2, :]        # (1, Tco) gamma
    be_row = p_ref[2:3, :]       # (1, Tco) beta

    # ---- Conv1d: K accumulated MXU matmuls, M = bt*H (batch folded into M) ----
    acc = None
    for k in range(K):
        s = _OFF - pad + k
        xk = xpad_ref[:, s:s + H, :].reshape(bt * H, c_in)
        wk = w_ref[k * c_in:(k + 1) * c_in, :]
        d = jnp.dot(xk, wk, preferred_element_type=jnp.float32)
        acc = d if acc is None else acc + d
    acc = acc + b_row                               # (bt*H, Tco) f32
    acc3 = acc.reshape(bt, H, tco)

    # ---- GroupNorm: two-pass (mean, then centered sum of squares) ----
    m_mat = m_ref[...]                              # (G_t, Tco)
    mt_mat = mt_ref[...]                            # (Tco, G_t)
    row_sum = jnp.sum(acc3, axis=1)                 # (bt, Tco)
    mean_g = jnp.dot(row_sum, mt_mat,
                     preferred_element_type=jnp.float32) * inv_cnt       # (bt, G_t)
    mean_c = jnp.dot(mean_g, m_mat, preferred_element_type=jnp.float32)  # (bt, Tco)
    cen = acc3 - mean_c[:, None, :]
    sq_sum = jnp.sum(cen * cen, axis=1)             # (bt, Tco)
    var_g = jnp.dot(sq_sum, mt_mat,
                    preferred_element_type=jnp.float32) * inv_cnt
    inv_g = lax.rsqrt(var_g + eps)
    inv_c = jnp.dot(inv_g, m_mat, preferred_element_type=jnp.float32)    # (bt, Tco)
    y = cen * (inv_c * g_row)[:, None, :] + be_row  # (bt, H, Tco)

    # ---- Activation (exact division; EUP exp) ----
    if mish:
        # mish(y) = y * tanh(softplus(y)) = y * ((1+e^y)^2 - 1) / ((1+e^y)^2 + 1)
        t = jnp.exp(jnp.minimum(y, 20.0))
        u2 = (1.0 + t) * (1.0 + t)
        act = y * ((u2 - 1.0) / (u2 + 1.0))
    else:
        # SiLU: y * sigmoid(y)
        act = y / (1.0 + jnp.exp(jnp.minimum(-y, 30.0)))

    # NWC -> NCW transpose in-kernel; store NCW output block directly.
    o_ref[...] = jnp.transpose(act, (0, 2, 1)).astype(o_ref.dtype)


# ----------------------------- wrapper ------------------------------------ #

def _round_up(n, m):
    return ((n + m - 1) // m) * m


def _vmem_capacity_bytes():
    try:
        info = pltpu.get_tpu_info()
        cap = getattr(info, "vmem_capacity_bytes", None)
        if cap:
            return int(cap)
    except Exception:
        pass
    return 64 << 20   # conservative fallback: v7x-sized VMEM


def conv1d_block(x, weight, bias, gamma, beta, *, n_groups=8, eps=1e-5,
                 mish=True, compute_dtype=jnp.bfloat16, out_dtype=None):
    """x: (B, C_in, H); weight: (C_out, C_in, K); bias/gamma/beta: (C_out,)."""
    B, C_in, H = x.shape
    C_out, C_in_w, K = weight.shape
    assert C_in_w == C_in
    assert C_out % n_groups == 0
    assert K % 2 == 1, "even kernel_size changes the output length; unsupported"
    group_size = C_out // n_groups
    pad = K // 2
    assert pad <= _OFF, "kernel_size too large for the fixed halo scratch"
    out_dtype = x.dtype if out_dtype is None else out_dtype

    cbytes = jnp.dtype(compute_dtype).itemsize
    obytes = jnp.dtype(out_dtype).itemsize
    xbytes = jnp.dtype(x.dtype).itemsize

    vmem_cap = _vmem_capacity_bytes()
    budget = int(0.45 * vmem_cap)              # working-set budget (incl. 2x bufs)

    lane_h = max(_round_up(H, 128), 128)
    lane_ci = max(_round_up(C_in, 128), 128)

    def _block_bytes(bt, tco):
        lane_co = max(_round_up(tco, 128), 128)
        g_t = tco // group_size
        x_b = bt * _round_up(C_in, 8) * lane_h * xbytes             # NCW input block
        w_b = _round_up(K * C_in, 8) * lane_co * cbytes
        p_b = 8 * lane_co * 4
        m_b = (_round_up(g_t, 8) * lane_co * 4
               + _round_up(tco, 8) * max(_round_up(g_t, 128), 128) * 4)
        o_b = bt * _round_up(tco, 8) * lane_h * obytes              # NCW output block
        scr = bt * _round_up(_OFF + H + 8, 8) * lane_ci * cbytes    # halo scratch
        tmp = (3 * bt * _round_up(H, 8) * lane_co * 4               # acc / cen / act
               + bt * _round_up(H, 8) * lane_ci * cbytes            # per-tap slice
               + bt * _round_up(H, 8) * lane_ci * 4)                # f32 transpose tmp
        return 2 * (x_b + w_b + p_b + m_b + o_b) + scr + tmp        # 2x: pipelining

    def _bt_for(tco):
        divs = [d for d in range(1, min(B, 32) + 1)
                if B % d == 0 and _block_bytes(d, tco) <= budget]
        if not divs:
            return None
        pref = [d for d in divs if B // d >= 2] or divs     # keep >=2 steps (megacore)
        good = [d for d in pref if d * H >= 512]            # fill the MXU M dim
        return min(good) if good else max(pref)

    # Prefer a resident weight (tco == C_out): it is then DMA'd exactly once.
    tco = C_out
    bt = _bt_for(C_out)
    if bt is None:
        unit = (128 * group_size) // math.gcd(128, group_size)
        cands = sorted((d for d in range(unit, C_out, unit) if C_out % d == 0),
                       reverse=True)
        for cand in cands:
            b_cand = _bt_for(cand)
            if b_cand is not None:
                bt, tco = b_cand, cand
                break
        if bt is None:
            raise ValueError("Conv1dBlock: no (bt, tco) tiling fits the VMEM budget")

    g_t = tco // group_size
    nb, nj = B // bt, C_out // tco

    # --- small host-side parameter prep (weights / per-channel params only) ---
    # w_flat[k*C_in + i, o] = weight[o, i, k]
    w_flat = jnp.transpose(weight, (2, 1, 0)).reshape(K * C_in, C_out)
    w_flat = w_flat.astype(compute_dtype)
    params = jnp.zeros((8, C_out), jnp.float32)
    params = params.at[0].set(bias.astype(jnp.float32))
    params = params.at[1].set(gamma.astype(jnp.float32))
    params = params.at[2].set(beta.astype(jnp.float32))
    ch = jnp.arange(tco, dtype=jnp.int32) // group_size
    m_mat = (ch[None, :] == jnp.arange(g_t, dtype=jnp.int32)[:, None]
             ).astype(jnp.float32)                                  # (G_t, tco)
    mt_mat = m_mat.T                                                # (tco, G_t)

    kernel = functools.partial(
        _conv1d_block_kernel,
        K=K, H=H, pad=pad, eps=eps, bt=bt,
        inv_cnt=1.0 / float(group_size * H), mish=mish)

    vmem_limit = int(min(0.78 * vmem_cap, max(32 << 20, 2 * _block_bytes(bt, tco))))

    cost = pl.CostEstimate(
        flops=2 * B * H * K * C_in * C_out + 12 * B * H * C_out,
        transcendentals=2 * B * H * C_out,
        bytes_accessed=(B * C_in * H * xbytes + K * C_in * C_out * cbytes
                        + B * C_out * H * obytes))

    return pl.pallas_call(
        kernel,
        out_shape=jax.ShapeDtypeStruct((B, C_out, H), out_dtype),
        grid_spec=pltpu.PrefetchScalarGridSpec(
            num_scalar_prefetch=0,
            grid=(nb, nj),
            in_specs=[
                pl.BlockSpec((bt, C_in, H), lambda b, j: (b, 0, 0)),
                pl.BlockSpec((K * C_in, tco), lambda b, j: (0, j)),
                pl.BlockSpec((8, tco), lambda b, j: (0, j)),
                pl.BlockSpec((g_t, tco), lambda b, j: (0, 0)),
                pl.BlockSpec((tco, g_t), lambda b, j: (0, 0)),
            ],
            out_specs=pl.BlockSpec((bt, tco, H), lambda b, j: (b, j, 0)),
            scratch_shapes=[pltpu.VMEM((bt, _OFF + H + 8, C_in), compute_dtype)],
        ),
        compiler_params=pltpu.CompilerParams(
            dimension_semantics=("parallel", "arbitrary"),
            vmem_limit_bytes=vmem_limit),
        cost_estimate=cost,
    )(x, w_flat, params, m_mat, mt_mat)


# ----------------------------- reference ----------------------------------- #

def _reference(x, weight, bias, gamma, beta, n_groups=8, eps=1e-5):
    """Pure-JAX (f32) reference for the PyTorch Conv1dBlock forward (Mish)."""
    B, C_in, H = x.shape
    C_out, _, K = weight.shape
    pad = K // 2
    xp = jnp.pad(x, ((0, 0), (0, 0), (pad, pad)))
    y = jnp.zeros((B, C_out, H), jnp.float32)
    for k in range(K):
        y = y + jnp.einsum('oi,bih->boh', weight[:, :, k], xp[:, :, k:k + H])
    y = y + bias[None, :, None]
    g = y.reshape(B, n_groups, C_out // n_groups, H)
    mean = g.mean(axis=(2, 3), keepdims=True)
    var = g.var(axis=(2, 3), keepdims=True)
    g = (g - mean) / jnp.sqrt(var + eps)
    y = g.reshape(B, C_out, H) * gamma[None, :, None] + beta[None, :, None]
    return y * jnp.tanh(jax.nn.softplus(y))


if __name__ == "__main__":
    B, C_in, C_out, H, K, n_groups = 2, 4, 16, 16, 3, 8

    key = jax.random.PRNGKey(0)
    kx, kw, kb, kg, kbe = jax.random.split(key, 5)

    x = jax.random.normal(kx, (B, C_in, H), dtype=jnp.float32)
    weight = jax.random.normal(kw, (C_out, C_in, K), dtype=jnp.float32) * 0.1
    bias = jax.random.normal(kb, (C_out,), dtype=jnp.float32) * 0.1
    gamma = 1.0 + 0.1 * jax.random.normal(kg, (C_out,), dtype=jnp.float32)
    beta = 0.1 * jax.random.normal(kbe, (C_out,), dtype=jnp.float32)

    out = conv1d_block(x, weight, bias, gamma, beta, n_groups=n_groups)
    out = jax.block_until_ready(out)

    ref = _reference(x, weight, bias, gamma, beta, n_groups=n_groups)
    assert out.shape == (B, C_out, H)
    # bf16 MXU inputs (f32 accumulation / two-pass stats / exact epilogue).
    assert jnp.allclose(out, ref, rtol=2e-2, atol=2e-2), "mismatch vs reference"

    print("KERNEL_OK")
</pallas_src>

<mosaic_0001>
module attributes {stable_mosaic.version = 11 : i64} {
  func.func @_conv1d_block_kernel(%arg0: i32, %arg1: i32, %arg2: memref<1x4x16xf32, #tpu.memory_space<vmem>>, %arg3: memref<12x16xbf16, #tpu.memory_space<vmem>>, %arg4: memref<8x16xf32, #tpu.memory_space<vmem>>, %arg5: memref<8x16xf32, #tpu.memory_space<vmem>>, %arg6: memref<16x8xf32, #tpu.memory_space<vmem>>, %arg7: memref<1x16x16xf32, #tpu.memory_space<vmem>>, %arg8: memref<1x32x4xbf16, #tpu.memory_space<vmem>>) attributes {dimension_semantics = [#tpu.dimension_semantics<parallel>, #tpu.dimension_semantics<arbitrary>], iteration_bounds = array<i64: 2, 1>, scalar_prefetch = 0 : i64, scratch_operands = 1 : i64, tpu.core_type = #tpu.core_type<tc>, window_params = [{transform_indices = @transform_0, window_bounds = array<i64: 1, 4, 16>}, {transform_indices = @transform_1, window_bounds = array<i64: 12, 16>}, {transform_indices = @transform_2, window_bounds = array<i64: 8, 16>}, {pipeline_mode = #tpu.pipeline_mode<synchronous>, transform_indices = @transform_3, window_bounds = array<i64: 8, 16>}, {pipeline_mode = #tpu.pipeline_mode<synchronous>, transform_indices = @transform_4, window_bounds = array<i64: 16, 8>}, {transform_indices = @transform_5, window_bounds = array<i64: 1, 16, 16>}]} {
    %c0_i32 = arith.constant 0 : i32
    %0 = arith.cmpi eq, %arg1, %c0_i32 : i32
    %1 = arith.extui %0 : i1 to i32
    %c0_i32_0 = arith.constant 0 : i32
    %2 = arith.cmpi ne, %1, %c0_i32_0 : i32
    scf.if %2 {
      %cst_38 = arith.constant 0.000000e+00 : bf16
      %65 = vector.broadcast %cst_38 : bf16 to vector<1x1x4xbf16>
      %c0_39 = arith.constant 0 : index
      %c7_40 = arith.constant 7 : index
      %c0_41 = arith.constant 0 : index
      %66 = vector.load %arg8[%c0_39, %c7_40, %c0_41] : memref<1x32x4xbf16, #tpu.memory_space<vmem>>, vector<1x1x4xbf16>
      tpu.vector_store %arg8[%c0_39, %c7_40, %c0_41], %65 {strides = array<i32>} : memref<1x32x4xbf16, #tpu.memory_space<vmem>>, vector<1x1x4xbf16>,
      %cst_42 = arith.constant 0.000000e+00 : bf16
      %67 = vector.broadcast %cst_42 : bf16 to vector<1x1x4xbf16>
      %c0_43 = arith.constant 0 : index
      %c24 = arith.constant 24 : index
      %c0_44 = arith.constant 0 : index
      %68 = vector.load %arg8[%c0_43, %c24, %c0_44] : memref<1x32x4xbf16, #tpu.memory_space<vmem>>, vector<1x1x4xbf16>
      tpu.vector_store %arg8[%c0_43, %c24, %c0_44], %67 {strides = array<i32>} : memref<1x32x4xbf16, #tpu.memory_space<vmem>>, vector<1x1x4xbf16>,
      %c0_45 = arith.constant 0 : index
      %c0_46 = arith.constant 0 : index
      %c0_47 = arith.constant 0 : index
      %69 = vector.load %arg2[%c0_45, %c0_46, %c0_47] : memref<1x4x16xf32, #tpu.memory_space<vmem>>, vector<1x4x16xf32>
      %70 = tpu.transpose %69, [0, 2, 1] : vector<1x4x16xf32> -> vector<1x16x4xf32>
      %71 = arith.truncf %70 : vector<1x16x4xf32> to vector<1x16x4xbf16>
      %c0_48 = arith.constant 0 : index
      %c8_49 = arith.constant 8 : index
      %c0_50 = arith.constant 0 : index
      %72 = vector.load %arg8[%c0_48, %c8_49, %c0_50] : memref<1x32x4xbf16, #tpu.memory_space<vmem>>, vector<1x16x4xbf16>
      tpu.vector_store %arg8[%c0_48, %c8_49, %c0_50], %71 {strides = array<i32>} : memref<1x32x4xbf16, #tpu.memory_space<vmem>>, vector<1x16x4xbf16>,
    } else {
    }
    %c0 = arith.constant 0 : index
    %c0_1 = arith.constant 0 : index
    %3 = vector.load %arg4[%c0, %c0_1] : memref<8x16xf32, #tpu.memory_space<vmem>>, vector<1x16xf32>
    %c1 = arith.constant 1 : index
    %c0_2 = arith.constant 0 : index
    %4 = vector.load %arg4[%c1, %c0_2] : memref<8x16xf32, #tpu.memory_space<vmem>>, vector<1x16xf32>
    %c2 = arith.constant 2 : index
    %c0_3 = arith.constant 0 : index
    %5 = vector.load %arg4[%c2, %c0_3] : memref<8x16xf32, #tpu.memory_space<vmem>>, vector<1x16xf32>
    %c0_4 = arith.constant 0 : index
    %c7 = arith.constant 7 : index
    %c0_5 = arith.constant 0 : index
    %6 = vector.load %arg8[%c0_4, %c7, %c0_5] : memref<1x32x4xbf16, #tpu.memory_space<vmem>>, vector<1x16x4xbf16>
    %7 = vector.shape_cast %6 : vector<1x16x4xbf16> to vector<16x4xbf16>
    %c0_6 = arith.constant 0 : index
    %c0_7 = arith.constant 0 : index
    %8 = vector.load %arg3[%c0_6, %c0_7] : memref<12x16xbf16, #tpu.memory_space<vmem>>, vector<4x16xbf16>
    %cst = arith.constant dense<0.000000e+00> : vector<16x16xf32>
    %9 = tpu.matmul %7, %8, %cst {dimension_numbers = #tpu.dot_dimension_numbers<[1], [0], [0], [1], [0, 0, 1, 1], [], []>} : vector<16x4xbf16>, vector<4x16xbf16>, vector<16x16xf32> -> vector<16x16xf32>
    %c0_8 = arith.constant 0 : index
    %c8 = arith.constant 8 : index
    %c0_9 = arith.constant 0 : index
    %10 = vector.load %arg8[%c0_8, %c8, %c0_9] : memref<1x32x4xbf16, #tpu.memory_space<vmem>>, vector<1x16x4xbf16>
    %11 = vector.shape_cast %10 : vector<1x16x4xbf16> to vector<16x4xbf16>
    %c4 = arith.constant 4 : index
    %c0_10 = arith.constant 0 : index
    %12 = vector.load %arg3[%c4, %c0_10] : memref<12x16xbf16, #tpu.memory_space<vmem>>, vector<4x16xbf16>
    %cst_11 = arith.constant dense<0.000000e+00> : vector<16x16xf32>
    %13 = tpu.matmul %11, %12, %cst_11 {dimension_numbers = #tpu.dot_dimension_numbers<[1], [0], [0], [1], [0, 0, 1, 1], [], []>} : vector<16x4xbf16>, vector<4x16xbf16>, vector<16x16xf32> -> vector<16x16xf32>
    %14 = arith.addf %9, %13 : vector<16x16xf32>
    %c0_12 = arith.constant 0 : index
    %c9 = arith.constant 9 : index
    %c0_13 = arith.constant 0 : index
    %15 = vector.load %arg8[%c0_12, %c9, %c0_13] : memref<1x32x4xbf16, #tpu.memory_space<vmem>>, vector<1x16x4xbf16>
    %16 = vector.shape_cast %15 : vector<1x16x4xbf16> to vector<16x4xbf16>
    %c8_14 = arith.constant 8 : index
    %c0_15 = arith.constant 0 : index
    %17 = vector.load %arg3[%c8_14, %c0_15] : memref<12x16xbf16, #tpu.memory_space<vmem>>, vector<4x16xbf16>
    %cst_16 = arith.constant dense<0.000000e+00> : vector<16x16xf32>
    %18 = tpu.matmul %16, %17, %cst_16 {dimension_numbers = #tpu.dot_dimension_numbers<[1], [0], [0], [1], [0, 0, 1, 1], [], []>} : vector<16x4xbf16>, vector<4x16xbf16>, vector<16x16xf32> -> vector<16x16xf32>
    %19 = arith.addf %14, %18 : vector<16x16xf32>
    %20 = vector.broadcast %3 : vector<1x16xf32> to vector<16x16xf32>
    %21 = arith.addf %19, %20 : vector<16x16xf32>
    %22 = vector.shape_cast %21 : vector<16x16xf32> to vector<1x16x16xf32>
    %c0_17 = arith.constant 0 : index
    %c0_18 = arith.constant 0 : index
    %23 = vector.load %arg5[%c0_17, %c0_18] : memref<8x16xf32, #tpu.memory_space<vmem>>, vector<8x16xf32>
    %c0_19 = arith.constant 0 : index
    %c0_20 = arith.constant 0 : index
    %24 = vector.load %arg6[%c0_19, %c0_20] : memref<16x8xf32, #tpu.memory_space<vmem>>, vector<16x8xf32>
    %cst_21 = arith.constant dense<0.000000e+00> : vector<1x16xf32>
    %25 = vector.multi_reduction <add>, %22, %cst_21 [1] : vector<1x16x16xf32> to vector<1x16xf32>
    %cst_22 = arith.constant dense<0.000000e+00> : vector<1x8xf32>
    %26 = tpu.matmul %25, %24, %cst_22 {dimension_numbers = #tpu.dot_dimension_numbers<[1], [0], [0], [1], [0, 0, 1, 1], [], []>} : vector<1x16xf32>, vector<16x8xf32>, vector<1x8xf32> -> vector<1x8xf32>
    %cst_23 = arith.constant 3.125000e-02 : f32
    %27 = vector.broadcast %cst_23 : f32 to vector<1x8xf32>
    %28 = arith.mulf %26, %27 : vector<1x8xf32>
    %cst_24 = arith.constant dense<0.000000e+00> : vector<1x16xf32>
    %29 = tpu.matmul %28, %23, %cst_24 {dimension_numbers = #tpu.dot_dimension_numbers<[1], [0], [0], [1], [0, 0, 1, 1], [], []>} : vector<1x8xf32>, vector<8x16xf32>, vector<1x16xf32> -> vector<1x16xf32>
    %30 = vector.shape_cast %29 : vector<1x16xf32> to vector<1x1x16xf32>
    %31 = vector.broadcast %30 : vector<1x1x16xf32> to vector<1x16x16xf32>
    %32 = arith.subf %22, %31 : vector<1x16x16xf32>
    %33 = arith.mulf %32, %32 : vector<1x16x16xf32>
    %cst_25 = arith.constant dense<0.000000e+00> : vector<1x16xf32>
    %34 = vector.multi_reduction <add>, %33, %cst_25 [1] : vector<1x16x16xf32> to vector<1x16xf32>
    %cst_26 = arith.constant dense<0.000000e+00> : vector<1x8xf32>
    %35 = tpu.matmul %34, %24, %cst_26 {dimension_numbers = #tpu.dot_dimension_numbers<[1], [0], [0], [1], [0, 0, 1, 1], [], []>} : vector<1x16xf32>, vector<16x8xf32>, vector<1x8xf32> -> vector<1x8xf32>
    %cst_27 = arith.constant 3.125000e-02 : f32
    %36 = vector.broadcast %cst_27 : f32 to vector<1x8xf32>
    %37 = arith.mulf %35, %36 : vector<1x8xf32>
    %cst_28 = arith.constant 9.99999974E-6 : f32
    %38 = vector.broadcast %cst_28 : f32 to vector<1x8xf32>
    %39 = arith.addf %37, %38 : vector<1x8xf32>
    %40 = math.rsqrt %39 : vector<1x8xf32>
    %cst_29 = arith.constant dense<0.000000e+00> : vector<1x16xf32>
    %41 = tpu.matmul %40, %23, %cst_29 {dimension_numbers = #tpu.dot_dimension_numbers<[1], [0], [0], [1], [0, 0, 1, 1], [], []>} : vector<1x8xf32>, vector<8x16xf32>, vector<1x16xf32> -> vector<1x16xf32>
    %42 = arith.mulf %41, %4 : vector<1x16xf32>
    %43 = vector.shape_cast %42 : vector<1x16xf32> to vector<1x1x16xf32>
    %44 = vector.broadcast %43 : vector<1x1x16xf32> to vector<1x16x16xf32>
    %45 = arith.mulf %32, %44 : vector<1x16x16xf32>
    %46 = vector.shape_cast %5 : vector<1x16xf32> to vector<1x1x16xf32>
    %47 = vector.broadcast %46 : vector<1x1x16xf32> to vector<1x16x16xf32>
    %48 = arith.addf %45, %47 : vector<1x16x16xf32>
    %cst_30 = arith.constant 2.000000e+01 : f32
    %49 = vector.broadcast %cst_30 : f32 to vector<1x16x16xf32>
    %50 = arith.minimumf %48, %49 : vector<1x16x16xf32>
    %51 = math.exp %50 : vector<1x16x16xf32>
    %cst_31 = arith.constant 1.000000e+00 : f32
    %52 = vector.broadcast %cst_31 : f32 to vector<1x16x16xf32>
    %53 = arith.addf %52, %51 : vector<1x16x16xf32>
    %cst_32 = arith.constant 1.000000e+00 : f32
    %54 = vector.broadcast %cst_32 : f32 to vector<1x16x16xf32>
    %55 = arith.addf %54, %51 : vector<1x16x16xf32>
    %56 = arith.mulf %53, %55 : vector<1x16x16xf32>
    %cst_33 = arith.constant 1.000000e+00 : f32
    %57 = vector.broadcast %cst_33 : f32 to vector<1x16x16xf32>
    %58 = arith.subf %56, %57 : vector<1x16x16xf32>
    %cst_34 = arith.constant 1.000000e+00 : f32
    %59 = vector.broadcast %cst_34 : f32 to vector<1x16x16xf32>
    %60 = arith.addf %56, %59 : vector<1x16x16xf32>
    %61 = arith.divf %58, %60 : vector<1x16x16xf32>
    %62 = arith.mulf %48, %61 : vector<1x16x16xf32>
    %63 = tpu.transpose %62, [0, 2, 1] : vector<1x16x16xf32> -> vector<1x16x16xf32>
    %c0_35 = arith.constant 0 : index
    %c0_36 = arith.constant 0 : index
    %c0_37 = arith.constant 0 : index
    %64 = vector.load %arg7[%c0_35, %c0_36, %c0_37] : memref<1x16x16xf32, #tpu.memory_space<vmem>>, vector<1x16x16xf32>
    tpu.vector_store %arg7[%c0_35, %c0_36, %c0_37], %63 {strides = array<i32>} : memref<1x16x16xf32, #tpu.memory_space<vmem>>, vector<1x16x16xf32>,
    return
  }
  func.func @transform_0(%arg0: i32, %arg1: i32) -> (i32, i32, i32) {
    %c0_i32 = arith.constant 0 : i32
    %c0_i32_0 = arith.constant 0 : i32
    %c0_i32_1 = arith.constant 0 : i32
    return %arg0, %c0_i32, %c0_i32_0 : i32, i32, i32
  }
  func.func @transform_1(%arg0: i32, %arg1: i32) -> (i32, i32) {
    %c0_i32 = arith.constant 0 : i32
    %c0_i32_0 = arith.constant 0 : i32
    return %c0_i32, %arg1 : i32, i32
  }
  func.func @transform_2(%arg0: i32, %arg1: i32) -> (i32, i32) {
    %c0_i32 = arith.constant 0 : i32
    %c0_i32_0 = arith.constant 0 : i32
    return %c0_i32, %arg1 : i32, i32
  }
  func.func @transform_3(%arg0: i32, %arg1: i32) -> (i32, i32) {
    %c0_i32 = arith.constant 0 : i32
    %c0_i32_0 = arith.constant 0 : i32
    %c0_i32_1 = arith.constant 0 : i32
    return %c0_i32, %c0_i32_0 : i32, i32
  }
  func.func @transform_4(%arg0: i32, %arg1: i32) -> (i32, i32) {
    %c0_i32 = arith.constant 0 : i32
    %c0_i32_0 = arith.constant 0 : i32
    %c0_i32_1 = arith.constant 0 : i32
    return %c0_i32, %c0_i32_0 : i32, i32
  }
  func.func @transform_5(%arg0: i32, %arg1: i32) -> (i32, i32, i32) {
    %c0_i32 = arith.constant 0 : i32
    %c0_i32_0 = arith.constant 0 : i32
    return %arg0, %arg1, %c0_i32 : i32, i32, i32
  }
}

</mosaic_0001>

<bundles_post_ra>
// kernel: tpu_custom_call.1
= control target key start
LH: loop header
LB: loop body
LE: loop exit
PB: predicated region body
PF: predicated region fallthrough
CT: control target
= control target key end

     0   :  { %10 = vsyncpa [#allocation4], 0  ;;  %s1610_s0 = inlined_call_operand.vmem [shape: f32[2,4,16], index: 0, kind: input, shape index: {}]   ;;  %s1611_s1 = inlined_call_operand.vmem [shape: bf16[12,16], index: 1, kind: input, shape index: {}]   ;;  %s1612_s2 = inlined_call_operand.vmem [shape: f32[8,16], index: 2, kind: input, shape index: {}]   ;;  %s1613_s3 = inlined_call_operand.hbm [shape: f32[8,16], index: 3, kind: input, shape index: {}]   ;;  %s1614_s4 = inlined_call_operand.vmem [shape: f32[16,8], index: 4, kind: input, shape index: {}]   ;;  %s1615_s5 = inlined_call_operand.hbm [shape: f32[2,16,16], index: 5, kind: output, shape index: {}]  }
   0x1   :  { %11 = vsyncpa [#allocation5], 0 }
   0x2   :  { %13 = vsyncpa [#allocation5 + $0x1], 0  ;;  %s1396_s18 = smov 0   ;;  %s1398_s19 = smov 0  }
   0x3   :  { %s1400_s20 = smov 0   ;;  %s1402_s21 = smov 0  }
   0x4   :  { %s1404_s22 = smov 0   ;;  %s1406_s23 = smov 0  }
   0x5 LB: > { %s1072_s24 = sadd.s32 4294967295, %s1357_s23   ;;  %s1073_s25 = sadd.s32 4294967294, %s1357_s23   ;;  %s1357_s23 = sphi %s1406_s23, %s19_s23   ;;  %s1353_s22 = sphi %s1404_s22, %s1633_s22   ;;  %s1349_s21 = sphi %s1402_s21, %s1632_s21   ;;  %s1345_s20 = sphi %s1400_s20, %s1631_s20   ;;  %s1341_s19 = sphi %s1398_s19, %s1630_s19   ;;  %s1337_s18 = sphi %s1396_s18, %s1629_s18  }
   0x6   : > { %s31_s26 = sadd.s32 1, %s1353_s22  ;;  %s160_s27 = sadd.s32 1, %s1345_s20 }
   0x7   : > { %p33_p0 = scmp.ge.s32.totalorder %s31_s26, 2  ;;  %p170_p1 = scmp.ne.s32.totalorder %s1345_s20, %s1341_s19 }
   0x8   : > { %p171_p2 = scmp.eq.s32.totalorder %s1072_s24, 1  ;;  %p176_p3 = scmp.ne.s32.totalorder %s1341_s19, %s1337_s18 }
   0x9   : > { %s1635_s26 = smov (%p33_p0, %s31_s26), 0  ;;  %p177_p5 = scmp.eq.s32.totalorder %s1073_s25, 1 }
   0xa   : > { %p1436_p4 = por %p171_p2, %p170_p1  ;;  %s155_s29 = ssub.s32 %s1353_s22, %s1635_s26 }
   0xb   : > { %p1074_p6 = scmp.ge.s32.totalorder %s1357_s23, 1  ;;  %p158_p7 = scmp.eq.s32.totalorder %s155_s29, 0 }
   0xc   : > { %s1620_s28 = scalar_select %p1436_p4, 1, 0 }
   0xd   : > { %p1443_p8 = por %p177_p5, %p176_p3  ;;  %p184_p9 = scmp.lt.s32.totalorder %s1357_s23, 3 }
   0xe   : > { %s1449_s6 = scalar_select %p158_p7, %s1345_s20, %s160_s27  }
   0xf   : > { %s1621_s30 = scalar_select %p1443_p8, 1, 0 }
  0x10   : > { %p1451_p10 = pnand %p1074_p6, %p184_p9  ;;  %p1455_p11 = scmp.eq.s32.totalorder %s1072_s24, 0 }
  0x11   : > { %s1359_s9 = smov [#allocation3]   ;;  %s1247_s14 = scalar_lea.hbm %s1613_s3, 128 }
  0x12   : > { %s1622_s7 = scalar_select %p1451_p10, 1, 0 }
  0x13   : > { %s1623_s8 = scalar_select %p1455_p11, 1, 0 }
  0x14   : > { %p1171_p12 = pneg %p1451_p10  ;;  %s211_s10 = sshll.u32 %s1359_s9, 4  ;;  %s212_s10 = int_to_ptr.vmem [resolvable:$true] %s211_s10 }
  0x15   : > { %p1248_p0 = scmp.ne.s32.totalorder %s1613_s3, %s1247_s14  ;;  %p1254_p5 = scmp.lt.u32.totalorder %s1247_s14, %s1613_s3 }
  0x16   : > { %p1463_p13 = pnand %p1455_p11, %p1171_p12 }
  0x18   : > { %p1249_p1 = pneg %p1463_p13 }
  0x1a   : > { %p1250_p2 = pnand %p1249_p1, %p1248_p0 }
  0x1c   : > { %p1251_p3 = pneg %p1250_p2 }
  0x1e   : > { %p1256_p6 = pnand %p1254_p5, %p1251_p3 }
  0x20   : > { %1259 = shalt.err (!%p1256_p6)
}
  0x21   : > { %s1260_s25 = scalar_lea.vmem %s212_s10, 128  ;;  %p1268_p8 = scmp.lt.s32.totalorder %s212_s10, %s212_s10 }
  0x22   : > { %p1261_p7 = scmp.ne.s32.totalorder %s212_s10, %s1260_s25  ;;  %p1269_p4 = scmp.lt.s32.totalorder %s1260_s25, %s1260_s25 }
  0x24   : > { %p1263_p9 = pnand %p1261_p7, %p1249_p1  ;;  %p1270_p11 = por %p1269_p4, %p1268_p8 }
  0x26   : > { %p1264_p12 = pneg %p1263_p9 }
  0x28   : > { %p1271_p10 = pnand %p1270_p11, %p1264_p12 }
  0x2a   : > { %1274 = shalt.err (!%p1271_p10)
}
  0x2b   : > { %1174 = dma.hbm_to_vmem [thread:$0]  (!%p1463_p13), %s1613_s3, 128, %s212_s10, [#allocation4]  }
  0x2c   : > { %p1625_p0 = scmp.ne.s32.totalorder %s1622_s7, 0 }
  0x2d   : > { %p1626_p2 = scmp.ne.s32.totalorder (!%p1625_p0), %s1623_s8, 0 }
  0x2e   : > { %234 = sbr.rel (%p1625_p0) target bundleno = 1529 (0x5f9), region = 40 }
  0x35   : > { %1328 = dma.done.wait (%p1626_p2), [#allocation4], 128  }
  0x36   : > { %1330 = vsyncadd (%p1626_p2), [#allocation4], 4294967168  ;;  %p269_p4 = scmp.lt.s32.totalorder %s1349_s21, 1  ;;  %vm287_vm0 = vcmask 27651   ;;  %vm288_vm1 = vsmask.f32 7950 }
  0x37   : > { %vm293_vm2 = vcmask 28676   ;;  %vm294_vm3 = vsmask.f32 4352  ;;  %vm289_vm4 = vmand %vm287_vm0, %vm288_vm1  ;;  %v290_v1 = vld [vmem:[#allocation2] sm:$0x8]  ;;  %v1360_v5 = vmov 0.0  }
  0x38   : > { %s270_s9 = scalar_select %p269_p4, %s1349_s21, 1  ;;  %v296_v2 = vld [vmem:[#allocation2 + $0x8] sm:$0x10]  ;;  %v291_v3 = vsel %vm289_vm4, 0, %v290_v1  ;;  %vm295_vm5 = vmand %vm293_vm2, %vm294_vm3  ;;  %1117 = vmatprep.subr.bf16.mxu0 %v1360_v5  ;;  %vm362_vm6 = vcmask 1041408   ;;  %vm1361_vm7 = vmmov 0   ;;  %1123 = vmatprep.subr.bf16.mxu1 %v1360_v5 }
  0x39   : > { %v1236_v4 = vld [vmem:[%s1611_s1] ss:$0 sps:$4 sm:$0xcc]   ;;  %292 = vst [vmem:[#allocation2] sm:$0x8] %v291_v3  ;;  %1119 = vmatprep.mubr.msk.bf16.mxu0 %vm1361_vm7, %v1360_v5  ;;  %v297_v6 = vsel %vm295_vm5, 0, %v296_v2  ;;  %1125 = vmatprep.mubr.msk.bf16.mxu1 %vm1361_vm7, %v1360_v5 }
  0x3a   : > { %s1082_s12 = sshll.u32 %s270_s9, 2  ;;  %v357_v7 = vrot.slane %v1236_v4, 2  ;;  %298 = vst [vmem:[#allocation2 + $0x8] sm:$0x10] %v297_v6  ;;  %v345_v9 = vld [vmem:[%s1611_s1] sm:$0x3] }
  0x3b   : > { %s272_s14 = scalar_lea.vmem %s1610_s0, %s1082_s12  ;;  %v429_v10 = vsel %vm362_vm6, %v345_v9, 0  ;;  %vm336_vm8 = vcmask 31748   ;;  %vm338_vm9 = vcmask 27648   ;;  %v473_v15 = vld [vmem:[%s1611_s1 + $0x4] sm:$0x3]  ;;  %vm350_vm10 = vcmask 1043456  }
  0x3c   : > { %v299_v0 = vld [vmem:[%s272_s14] sm:$0xf]  ;;  %v364_v8 = vsel %vm362_vm6, %v357_v7, 0  ;;  %1124 = vmatpush3.bf16.msra.mxu1 %v429_v10  ;;  %vm358_vm11 = vcmask 31744   ;;  %v496_v16 = vsel %vm362_vm6, %v473_v15, 0  ;;  %v549_v47 = vld [vmem:[%s1614_s4 + $0x8] sm:$0xff] }
  0x3d   : > { %300 = vxpose.xlu0.b32.start.end [1/1] (short) (narrow) %v299_v0, 16  ;;  %1118 = vmatpush3.bf16.msra.mxu0 %v364_v8  ;;  %vm474_vm12 = vsmask.f32 3328  ;;  %v548_v46 = vld [vmem:[%s1614_s4] sm:$0xff]  ;;  %v1362_v48 = vmov 0.0|0.0   ;;  %vm550_vm13 = vcmask 130048  }
  0x3e   : > { %1129 = vmatprep.subr.bf16.mxu0 %v1360_v5  ;;  %1159 = vmatprep.subr.bf16.mxu1 %v1362_v48  ;;  %v1160_v49 = vpack.c.bf16 %v549_v47, %v548_v46  ;;  %v1087_v60 = vld [vmem:[%s1612_s2] ss:$0 sm:$0xff]  ;;  %v547_v15 = vld [vmem:[#allocation3] sm:$0xff]  ;;  %vm634_vm14 = vcmask 64512   ;;  %v1092_v47 = vld [vmem:[%s1612_s2 + $0x2] ss:$0 sm:$0xff] }
  0x3f   : > { %s266_s8 = sand.u32 1, %s1341_s19   ;;  %s1100_s17 = sshll.u32 %s1349_s21, 8 }
  0x40   : > { %s1081_s10 = sshll.u32 %s266_s8, 4  ;;  %s1561_s27 = scalar_lea.hbm %s1615_s5, %s1100_s17 }
  0x41   : > { %s268_s15 = scalar_lea.vmem [#allocation6], %s1081_s10  ;;  %s1564_s29 = scalar_lea.sflag [#allocation5], %s266_s8 }
  0x42   : > { %s957_s16 = sshll.u32 %s268_s15, 4  ;;  %p1627_p10 = scmp.ne.s32.totalorder %s1620_s28, 0  ;;  %s1556_s16 = int_to_ptr.vmem [resolvable:$true] %s957_s16 }
  0x43   : > { %s1275_s9 = scalar_lea.vmem %s1556_s16, 256  ;;  %s1363_s21 = smov [#allocation6]  }
  0x44   : > { %p1276_p8 = scmp.ne.s32.totalorder %s1556_s16, %s1275_s9  ;;  %s1279_s12 = sshll.u32 %s1363_s21, 4  ;;  %s1280_s12 = int_to_ptr.vmem [resolvable:$false] %s1279_s12 }
  0x45   : > { %s1281_s13 = scalar_lea.vmem %s1280_s12, 512  ;;  %p1282_p1 = scmp.lt.s32.totalorder %s1556_s16, %s1280_s12 }
  0x46   : > { %p1277_p11 = pnand %p1276_p8, %p1627_p10  ;;  %p1283_p3 = scmp.lt.s32.totalorder %s1281_s13, %s1275_s9 }
  0x48   : > { %p1278_p13 = pneg %p1277_p11  ;;  %p1284_p5 = por %p1283_p3, %p1282_p1 }
  0x4a   : > { %p1285_p6 = pnand %p1284_p5, %p1278_p13 }
  0xbd   : > { %v316_v11 = vpop.trf.xlu0 }
  0xc1   : > { %v317_v12 = vpop.trf.xlu0 }
  0xc2   : > { %v332_v13 = vpack.c.bf16 %v317_v12, %v316_v11 }
  0xc4   : > { %v334_v14 = vrot.slane %v332_v13, 4 }
  0xc6   : > { %337 = vst.msk [vmem:[#allocation2] sm:$0xf0] %vm336_vm8, %v334_v14 }
  0xc7   : > { %339 = vst.msk [vmem:[#allocation2 + $0x8] sm:$0xf] %vm338_vm9, %v334_v14 }
  0xcd   : > { %v346_v18 = vld [vmem:[#allocation2] sm:$0xf0] }
  0xce   : > { %v344_v17 = vld [vmem:[#allocation2 + $0x8] sm:$0xf]  ;;  %v343_v19 = vld [vmem:[#allocation2] sm:$0xf8]  ;;  %v351_v20 = vrot.slane %v346_v18, 4  ;;  %v476_v22 = vshrl.u32 %v346_v18, 16 }
  0xcf   : > { %v352_v21 = vrot.slane %v344_v17, 4  ;;  %v479_v23 = vshll.u32 %v346_v18, 16  ;;  %v472_v24 = vld [vmem:[#allocation2 + $0x8] sm:$0x1f]  ;;  %v409_v25 = vshrl.u32 %v343_v19, 16  ;;  %v412_v26 = vshll.u32 %v343_v19, 16 }
  0xd0   : > { %v417_v27 = vshrl.u32 %v344_v17, 16  ;;  %v420_v28 = vshll.u32 %v344_v17, 16  ;;  %v478_v30 = vrot.slane %v476_v22, 4  ;;  %v484_v32 = vshrl.u32 %v472_v24, 16 }
  0xd1   : > { %v353_v29 = vsel %vm350_vm10, %v351_v20, %v352_v21  ;;  %v481_v31 = vrot.slane %v479_v23, 5  ;;  %v411_v33 = vrot.slane %v409_v25, 3  ;;  %v414_v34 = vrot.slane %v412_v26, 4 }
  0xd2   : > { %1120 = vmatmul.mubr.msk.bf16.vlgmr.msra.gmra.mrb[0].mxu0 %vm358_vm11, %v353_v29  ;;  %v419_v35 = vrot.slane %v417_v27, 3  ;;  %v422_v36 = vrot.slane %v420_v28, 4  ;;  %v486_v37 = vrot.slane %v484_v32, 4  ;;  %v487_v38 = vshll.u32 %v472_v24, 16 }
  0xd3   : > { %1130 = vmatpush3.bf16.msra.mxu0 %v496_v16  ;;  %1131 = vmatprep.mubr.msk.bf16.mxu0 %vm1361_vm7, %v1360_v5  ;;  %v415_v39 = vor.u32 %v414_v34, %v411_v33  ;;  %v482_v41 = vor.u32 %v481_v31, %v478_v30  ;;  %v708_v19 = vlaneseq }
  0xd4   : > { %v423_v40 = vor.u32 %v422_v36, %v419_v35  ;;  %v489_v42 = vrot.slane %v487_v38, 5  ;;  %1162 = vmatprep.subr.bf16.mxu0 %v1362_v48 }
  0xd5   : > { %v709_v20 = vshrl.u32 %v708_v19, 7 }
  0xd6   : > { %v424_v43 = vsel %vm294_vm3, %v415_v39, %v423_v40  ;;  %v490_v44 = vor.u32 %v489_v42, %v486_v37  ;;  %v341_v42 = vld [vmem:[%s1612_s2 + $0x1] sm:$0x1] }
  0xd7   : > { %1126 = vmatmul.mubr.msk.bf16.vlgmr.msra.gmra.mrb[0].mxu1 %vm358_vm11, %v424_v43  ;;  %v710_v21 = vsub.s32 0, %v709_v20 }
  0xd8   : > { %1139 = vmatprep.mubr.msk.f32.mxu1 %vm1361_vm7, %v1360_v5  ;;  %v491_v45 = vsel %vm474_vm12, %v482_v41, %v490_v44  ;;  %1161 = vmatpush3.bf16.msra.mxu1 %v1160_v49 }
  0xd9   : > { %1142 = vmatprep.subr.mxu1 %v1360_v5 }
  0xda   : > { %1132 = vmatmul.mubr.msk.bf16.vlgmr.msra.gmra.mrb[4].mxu0 %vm358_vm11, %v491_v45 }
  0xdb   : > { %1151 = vmatprep.mubr.msk.f32.mxu0 %vm1361_vm7, %v1360_v5  ;;  %1164 = vmatpush3.bf16.msra.mxu0 %v1160_v49 }
 0x1a5   : > { %v400_v50 = vpop.f32.mrb[0].mxu0 }
 0x1a6   : > { %v1121_v51 = vpop.f32.mrb[1].mxu0 }
 0x1a7   : > { %v403_v52 = vpop.f32.mrb[2].mxu0 }
 0x1a8   : > { %v1122_v53 = vpop.f32.mrb[3].mxu0 }
 0x1aa   : > { %v465_v54 = vpop.f32.mrb[0].mxu1 }
 0x1ab   : > { %v466_v55 = vadd.f32 %v465_v54, %v400_v50  ;;  %v1127_v56 = vpop.f32.mrb[1].mxu1 }
 0x1ac   : > { %v468_v57 = vpop.f32.mrb[2].mxu1 }
 0x1ad   : > { %v469_v58 = vadd.f32 %v468_v57, %v403_v52  ;;  %v1128_v59 = vpop.f32.mrb[3].mxu1  ;;  %v532_v61 = vpop.f32.mrb[4].mxu0 }
 0x1ae   : > { %v539_v62 = vadd.f32 %v532_v61, %v466_v55  ;;  %v1133_v63 = vpop.f32.mrb[5].mxu0 }
 0x1af   : > { %v535_v0 = vpop.f32.mrb[6].mxu0 }
 0x1b0   : > { %v545_v1 = vadd.f32 %v1087_v60, %v539_v62  ;;  %v540_v2 = vadd.f32 %v535_v0, %v469_v58  ;;  %v1134_v3 = vpop.f32.mrb[7].mxu0 }
 0x1b2   : > { %v546_v4 = vadd.f32 %v1087_v60, %v540_v2  ;;  %v551_v6 = vsel %vm550_vm13, %v545_v1, 0.0 }
 0x1b4   : > { %v552_v7 = vsel %vm550_vm13, %v546_v4, 0.0 }
 0x1b5   : > { %v553_v8 = vadd.f32 %v552_v7, %v551_v6 }
 0x1b7   : > { %v554_v9 = vrot.slane %v553_v8, 4 }
 0x1b9   : > { %v555_v10 = vadd.f32 %v554_v9, %v553_v8 }
 0x1bb   : > { %v556_v11 = vrot.slane %v555_v10, 2 }
 0x1bd   : > { %v557_v12 = vadd.f32 %v556_v11, %v555_v10 }
 0x1bf   : > { %v558_v13 = vrot.slane %v557_v12, 1 }
 0x1c1   : > { %v559_v14 = vadd.f32 %v558_v13, %v557_v12 }
 0x1c3   : > { %1140 = vmatmul.mubr.msk.f32.vlgmr.msra.gmra.mrb[4].mxu1 %vm550_vm13, %v559_v14 }
 0x1c4   : > { %1143 = vmatpush3.msra.mxu1 %v547_v15  ;;  %1144 = vmatprep.mubr.msk.f32.mxu1 %vm1361_vm7, %v1360_v5 }
 0x1c5   : > { %1154 = vmatprep.subr.mxu1 %v1360_v5 }
 0x296   : > { %v629_v16 = vpop.f32.mrb[4].mxu1 }
 0x297   : > { %v633_v17 = vmul.f32 0.03125, %v629_v16  ;;  %v1141_v18 = vpop.f32.mrb[5].mxu1 }
 0x299   : > { %1145 = vmatmul.mubr.msk.f32.vlgmr.msra.gmra.mrb[6].mxu1 %vm634_vm14, %v633_v17 }
 0x29a   : > { %1155 = vmatpush3.msra.mxu1 %v547_v15  ;;  %1156 = vmatprep.mubr.msk.f32.mxu1 %vm1361_vm7, %v1360_v5 }
 0x36c   : > { %v704_v22 = vpop.f32.mrb[6].mxu1 }
 0x36d   : > { %v711_v23 = vrot.slane %v704_v22, %v710_v21  ;;  %v1146_v24 = vpop.f32.mrb[7].mxu1 }
 0x36f   : > { %v712_v25 = vsub.f32 %v545_v1, %v711_v23  ;;  %v713_v26 = vsub.f32 %v546_v4, %v711_v23 }
 0x371   : > { %v714_v27 = vmul.f32 %v712_v25, %v712_v25  ;;  %v715_v28 = vmul.f32 %v713_v26, %v713_v26 }
 0x373   : > { %v716_v29 = vsel %vm550_vm13, %v714_v27, 0.0  ;;  %v717_v30 = vsel %vm550_vm13, %v715_v28, 0.0 }
 0x374   : > { %v718_v31 = vadd.f32 %v717_v30, %v716_v29 }
 0x376   : > { %v719_v32 = vrot.slane %v718_v31, 4 }
 0x378   : > { %v720_v33 = vadd.f32 %v719_v32, %v718_v31 }
 0x37a   : > { %v721_v34 = vrot.slane %v720_v33, 2 }
 0x37c   : > { %v722_v35 = vadd.f32 %v721_v34, %v720_v33 }
 0x37e   : > { %v723_v5 = vrot.slane %v722_v35, 1 }
 0x380   : > { %v724_v36 = vadd.f32 %v723_v5, %v722_v35 }
 0x382   : > { %1152 = vmatmul.mubr.msk.f32.vlgmr.msra.gmra.mrb[8].mxu0 %vm550_vm13, %v724_v36 }
 0x455   : > { %v794_v37 = vpop.f32.mrb[8].mxu0 }
 0x456   : > { %v798_v38 = vmul.f32 0.03125, %v794_v37  ;;  %v1153_v39 = vpop.f32.mrb[9].mxu0 }
 0x458   : > { %v799_v40 = vadd.f32 1e-05, %v798_v38 }
 0x45a   : > { %1237 = vrsqrt.f32 %v799_v40 }
 0x464   : > { %v1238_v41 = vpop.eup %1237 }
 0x465   : > { %1157 = vmatmul.mubr.msk.f32.vlgmr.msra.gmra.mrb[8].mxu1 %vm634_vm14, %v1238_v41 }
 0x538   : > { %v870_v43 = vpop.f32.mrb[8].mxu1 }
 0x539   : > { %v874_v44 = vmul.f32 %v870_v43, %v341_v42  ;;  %v1158_v45 = vpop.f32.mrb[9].mxu1 }
 0x53b   : > { %v878_v46 = vrot.slane %v874_v44, %v710_v21 }
 0x53d   : > { %v879_v48 = vmul.f32 %v878_v46, %v712_v25  ;;  %v880_v49 = vmul.f32 %v878_v46, %v713_v26 }
 0x53f   : > { %v885_v50 = vadd.f32 %v1092_v47, %v879_v48  ;;  %v886_v51 = vadd.f32 %v1092_v47, %v880_v49 }
 0x541   : > { %v887_v52 = vmin.f32 %v885_v50, 20.0  ;;  %v888_v53 = vmin.f32 %v886_v51, 20.0 }
 0x543   : > { %v889_v54 = vmul.f32 1.442695, %v887_v52  ;;  %v891_v55 = vmul.f32 1.442695, %v888_v53 }
 0x545   : > { %1239 = vpow2.f32 %v889_v54 }
 0x546   : > { %1241 = vpow2.f32 %v891_v55 }
 0x54f   : > { %v1240_v56 = vpop.eup %1239 }
 0x550   : > { %v1242_v57 = vpop.eup %1241  ;;  %v893_v58 = vadd.f32 1.0, %v1240_v56 }
 0x551   : > { %v894_v59 = vadd.f32 1.0, %v1242_v57 }
 0x552   : > { %v895_v60 = vmul.f32 %v893_v58, %v893_v58 }
 0x553   : > { %v896_v61 = vmul.f32 %v894_v59, %v894_v59 }
 0x554   : > { %v899_v62 = vadd.f32 1.0, %v895_v60  ;;  %v1093_v0 = vadd.f32 -1.0, %v895_v60 }
 0x555   : > { %v900_v63 = vadd.f32 1.0, %v896_v61  ;;  %v1094_v4 = vadd.f32 -1.0, %v896_v61 }
 0x556   : > { %1243 = vrcp.f32 %v899_v62 }
 0x557   : > { %1245 = vrcp.f32 %v900_v63 }
 0x560   : > { %v1244_v1 = vpop.eup %1243 }
 0x561   : > { %v1246_v2 = vpop.eup %1245  ;;  %v902_v3 = vmul.f32 %v1244_v1, %v1093_v0 }
 0x562   : > { %v904_v7 = vmul.f32 %v1246_v2, %v1094_v4 }
 0x563   : > { %v905_v6 = vmul.f32 %v902_v3, %v885_v50 }
 0x564   : > { %v906_v8 = vmul.f32 %v904_v7, %v886_v51 }
 0x565   : > { %907 = vxpose.xlu0.b32.start [1/2] (short) (narrow) %v905_v6, 16 }
 0x569   : > { %908 = vxpose.xlu0.b32.end [2/2] (short) (narrow) %v906_v8, 16 }
 0x5e5   : > { %v923_v9 = vpop.trf.xlu0 }
 0x5e6   : > { %939 = vst.msk [vmem:[%s268_s15] sm:$0xff] %vm550_vm13, %v923_v9 }
 0x5e9   : > { %v924_v10 = vpop.trf.xlu0 }
 0x5ea   : > { %940 = vst.msk [vmem:[%s268_s15 + $0x8] sm:$0xff] %vm550_vm13, %v924_v10 }
 0x5eb   : > { %1288 = shalt.err (!%p1285_p6)
}
 0x5ec   : > { %s1289_s11 = scalar_lea.hbm %s1561_s27, 256  ;;  %s1293_s8 = scalar_lea.hbm %s1615_s5, 512 }
 0x5ed   : > { %p1290_p7 = scmp.ne.s32.totalorder %s1561_s27, %s1289_s11  ;;  %p1294_p0 = scmp.lt.u32.totalorder %s1561_s27, %s1615_s5 }
 0x5ee   : > { %p1295_p2 = scmp.lt.u32.totalorder %s1293_s8, %s1289_s11  ;;  %p1297_p8 = scmp.lt.u32.totalorder %s1289_s11, %s1561_s27 }
 0x5ef   : > { %p1291_p9 = pnand %p1290_p7, %p1627_p10 }
 0x5f0   : > { %p1296_p4 = por %p1295_p2, %p1294_p0 }
 0x5f1   : > { %p1292_p12 = pneg %p1291_p9 }
 0x5f2   : > { %p1298_p11 = por %p1297_p8, %p1296_p4 }
 0x5f4   : > { %p1299_p13 = pnand %p1298_p11, %p1292_p12 }
 0x5f6   : > { %1302 = shalt.err (!%p1299_p13)
}
 0x5f7   : > { %s1364_s17 = smov 128   ;;  %s1365_s24 = smov 8  }
 0x5f8   : > { %1169 = dma.vmem_to_hbm [thread:$0]  (%p1627_p10), %s1556_s16, 256, %s1561_s27, %s1564_s29, %s1364_s17, %s1364_s17, %s1365_s24  }
 0x5f9 PF: > { %p1181_p1 = scmp.ge.s32.totalorder %s1357_s23, 2  ;;  %s972_s25 = sand.u32 1, %s1337_s18  }
 0x5fa   : > { %p1628_p3 = scmp.ne.s32.totalorder %s1621_s30, 0  ;;  %s973_s9 = scalar_lea.sflag [#allocation5], %s972_s25 }
 0x5fc   : > { %p1176_p5 = pnand %p1181_p1, %p1628_p3 }
 0x5fe   : > { %1332 = dma.done.wait (!%p1176_p5), %s973_s9, 256  }
 0x5ff   : > { %1334 = vsyncadd (!%p1176_p5), %s973_s9, 4294967040  ;;  %s19_s23 = sadd.s32 1, %s1357_s23   ;;  %s1629_s18 = smov %s1341_s19 }
 0x600   : > { %p16_p6 = scmp.ge.s32.totalorder %s19_s23, 4   ;;  %s1630_s19 = smov %s1345_s20 }
 0x601   : > { %s1631_s20 = smov %s1449_s6  ;;  %s1632_s21 = smov %s1353_s22 }
 0x602   : > { %s1633_s22 = smov %s1635_s26  ;;  %18 = sbr.rel (!%p16_p6) target bundleno = 5 (0x5), region = 90 }
 0x609   :  { %978 = vsyncpa [#allocation4], 1 }
 0x60a   :  { %980 = vsyncpa [#allocation4 + $0x1], 1 }
 0x60b   :  { %981 = vsyncpa [#allocation5], 1 }
 0x60c   :  { %983 = vsyncpa [#allocation5 + $0x1], 1 }

</bundles_post_ra>
